<compile_context>
chip_gen: v5e
topology: v5e:2x2
jax: 0.10.0
libtpu: 0.0.40
codegen_flags: <defaults>
</compile_context>

<pallas_src>
import functools

import jax
import jax.numpy as jnp
from jax.experimental import pallas as pl
from jax.experimental.pallas import tpu as pltpu

SMOOTH = 1.0     # SoftDiceLoss default
DC_EPS = 1e-8    # epsilon added to the dice denominator


def _dc_bce_kernel(x_ref, y_ref, tp_ref, ss_ref, sy_ref, bce_ref, *,
                   s_total, tile_s, fold, steps_per_core, mask_needed):
    p = pl.program_id(0)      # core-split half of the spatial reduction (parallel)
    k = pl.program_id(2)      # spatial step inside this core's range (arbitrary, last)

    # Output blocks are resident across the reduction axis -> use as accumulators.
    @pl.when(k == 0)
    def _():
        tp_ref[...] = jnp.zeros_like(tp_ref)
        ss_ref[...] = jnp.zeros_like(ss_ref)
        sy_ref[...] = jnp.zeros_like(sy_ref)
        bce_ref[...] = jnp.zeros_like(bce_ref)

    x = x_ref[...].astype(jnp.float32)
    y = y_ref[...].astype(jnp.float32)

    n_fold = tile_s // fold

    def lane_fold(v):
        # (block_bc, tile_s) -> (block_bc, fold): vreg-aligned lane-chunk adds
        # (pure VPU, no XLU reduce, no data movement).
        r = v[:, 0:fold]
        for j in range(1, n_fold):
            r = r + v[:, j * fold:(j + 1) * fold]
        return r

    def accumulate(xv, yv, valid=None):
        if valid is not None:
            # NaN-safety: boundary lanes may hold uninitialized VMEM garbage;
            # select clean zeros BEFORE any transcendental.
            xv = jnp.where(valid, xv, 0.0)
            yv = jnp.where(valid, yv, 0.0)
        # One transcendental per element: e = exp(-|x|) feeds BCE and sigmoid.
        e = jnp.exp(-jnp.abs(xv))
        inv_1pe = pl.reciprocal(1.0 + e, approx=True)            # EUP, ~free slot
        s = jnp.where(xv >= 0.0, inv_1pe, e * inv_1pe)           # sigmoid(x)
        bce = jnp.maximum(xv, 0.0) - xv * yv + jnp.log1p(e)      # stable BCE w/ logits
        if valid is not None:
            # sigmoid(0)=0.5 and bce(0,0)=log 2 are NOT neutral: zero them out.
            s = jnp.where(valid, s, 0.0)
            bce = jnp.where(valid, bce, 0.0)
        tp_ref[0] += lane_fold(s * yv)     # tp
        ss_ref[0] += lane_fold(s)          # sum(sigmoid) -> fp = ss - tp
        sy_ref[0] += lane_fold(yv)         # sum(target)  -> fn = sy - tp
        bce_ref[0] += lane_fold(bce)       # per-row BCE partial sum

    if mask_needed:
        gk = p * steps_per_core + k                      # global spatial block index
        block_start = gk * tile_s
        is_boundary = block_start + tile_s > s_total     # partial or clamped-duplicate block

        @pl.when(is_boundary)
        def _():
            lane = jax.lax.broadcasted_iota(jnp.int32, x.shape, dimension=1)
            valid = (block_start + lane) < s_total
            accumulate(x, y, valid)

        @pl.when(jnp.logical_not(is_boundary))
        def _():
            accumulate(x, y)
    else:
        accumulate(x, y)


def _choose_tiles(BC, S, x_dtype, y_dtype):
    """Pick (block_bc, tile_s, fold, vmem_limit) with a generation-aware VMEM budget."""
    isx = jnp.dtype(x_dtype).itemsize
    isy = jnp.dtype(y_dtype).itemsize
    sub = 32 // min(isx, isy)    # strictest sublane multiple across both inputs

    # Generation-aware budgets: 128 MiB parts (v5e/v6e) get big blocks and a
    # large scoped limit; 64 MiB parts (v7x) stay conservative.
    try:
        vmem_cap = pltpu.get_tpu_info().vmem_capacity_bytes
    except Exception:  # unknown part / interpret mode -> assume the small (v7x) VMEM
        vmem_cap = 64 * 1024 * 1024
    if vmem_cap >= 128 * 1024 * 1024:          # v5e / v6e
        vmem_limit = 96 * 1024 * 1024
        work_budget = 48 * 1024 * 1024
        hard_cap = 112 * 1024 * 1024
    else:                                      # v7x (64 MiB physical VMEM)
        vmem_limit = 36 * 1024 * 1024
        work_budget = 18 * 1024 * 1024
        hard_cap = 56 * 1024 * 1024

    # Per-element VMEM cost: double-buffered native-dtype inputs + ~6 live f32
    # elementwise temporaries (x, y, e, 1/(1+e), s, bce).
    per_elem = 2 * (isx + isy) + 24

    block_bc = BC

    def tile_for(bbc):
        t = (work_budget // per_elem) // max(bbc, 1)
        return (t // 128) * 128

    tile_s = tile_for(block_bc)
    # If even 128 lanes blow the budget, shrink the (b,c) block while the halves
    # stay legal sublane multiples.
    while tile_s < 128 and block_bc % (2 * sub) == 0:
        block_bc //= 2
        tile_s = tile_for(block_bc)
    tile_s = max(tile_s, 128)
    tile_s = min(tile_s, 32768)     # keep unrolled lane-fold / temp code size sane

    if S < 128:
        tile_s = S                  # full-dim block (legal even if not 128-aligned)
    else:
        tile_s = min(tile_s, (S // 128) * 128)   # largest multiple of 128 <= S
        if tile_s >= 512:
            tile_s = (tile_s // 512) * 512       # keep tile_s a multiple of fold

    fold = min(tile_s, 512)

    # If block_bc could not shrink (BC not a legal multiple), raise the scoped
    # limit to cover the estimated working set rather than risk a compile failure.
    est = block_bc * tile_s * per_elem + 8 * block_bc * fold * 4
    vmem_limit = min(max(vmem_limit, int(est * 1.5)), hard_cap)

    return block_bc, tile_s, fold, vmem_limit


def dc_and_bce_loss(net_output, target):
    """net_output, target: (B, C, H, W) arrays (target = one-hot / soft labels)."""
    B, C, H, W = net_output.shape
    BC, S = B * C, H * W

    # Glue only: flatten to (B*C, H*W); keep native dtypes (kernel casts to f32).
    x2 = net_output.reshape(BC, S)
    y2 = target.reshape(BC, S)

    block_bc, tile_s, fold, vmem_limit = _choose_tiles(BC, S, x2.dtype, y2.dtype)

    n_s_blocks = pl.cdiv(S, tile_s)
    # v7x: split the spatial reduction across the 2 TensorCores when B*C cannot
    # be split (common for segmentation); near-no-op on v5e/v6e.
    n_split = 2 if n_s_blocks >= 2 else 1
    steps_per_core = pl.cdiv(n_s_blocks, n_split)
    n_bc_blocks = BC // block_bc
    mask_needed = (S % tile_s != 0) or (n_split * steps_per_core != n_s_blocks)

    last_block = n_s_blocks - 1

    def in_map(p, i, k):
        gk = p * steps_per_core + k
        # Clamp so the DMA never targets a fully out-of-range block; the kernel
        # masks the (duplicate / partial) boundary contribution.
        return (i, jnp.minimum(gk, last_block))

    in_spec = pl.BlockSpec((block_bc, tile_s), in_map)
    stat_spec = pl.BlockSpec((1, block_bc, fold), lambda p, i, k: (p, i, 0))
    stat_shape = jax.ShapeDtypeStruct((n_split, BC, fold), jnp.float32)

    kernel = functools.partial(
        _dc_bce_kernel, s_total=S, tile_s=tile_s, fold=fold,
        steps_per_core=steps_per_core, mask_needed=mask_needed)

    tp, ss, sy, bce = pl.pallas_call(
        kernel,
        out_shape=(stat_shape, stat_shape, stat_shape, stat_shape),
        grid_spec=pltpu.PrefetchScalarGridSpec(
            num_scalar_prefetch=0,
            grid=(n_split, n_bc_blocks, steps_per_core),
            in_specs=[in_spec, in_spec],
            out_specs=[stat_spec, stat_spec, stat_spec, stat_spec],
        ),
        compiler_params=pltpu.CompilerParams(
            dimension_semantics=("parallel", "parallel", "arbitrary"),
            vmem_limit_bytes=vmem_limit,
        ),
    )(x2, y2)

    # Tiny O(n_split * BC * fold) final combine in XLA (lane reduce + core-halves).
    tp = jnp.sum(tp, axis=(0, 2))
    ss = jnp.sum(ss, axis=(0, 2))
    sy = jnp.sum(sy, axis=(0, 2))
    bce_total = jnp.sum(bce)
    # fp + fn = (ss - tp) + (sy - tp)  =>  2*tp + fp + fn = ss + sy
    dc = (2.0 * tp + SMOOTH) / (ss + sy + SMOOTH + DC_EPS)
    ce = bce_total / jnp.float32(BC * S)
    return ce - jnp.mean(dc)


def _reference(net_output, target):
    """Pure-JAX reference matching the PyTorch module (exact sigmoid)."""
    x = net_output.astype(jnp.float32)
    y = target.astype(jnp.float32)
    ce = jnp.mean(jnp.maximum(x, 0.0) - x * y + jnp.log1p(jnp.exp(-jnp.abs(x))))
    s = jax.nn.sigmoid(x)
    axes = (2, 3)
    tp = jnp.sum(s * y, axis=axes)
    fp = jnp.sum(s * (1.0 - y), axis=axes)
    fn = jnp.sum((1.0 - s) * y, axis=axes)
    dc = (2.0 * tp + SMOOTH) / (2.0 * tp + fp + fn + SMOOTH + DC_EPS)
    return ce - jnp.mean(dc)


if __name__ == "__main__":
    key = jax.random.PRNGKey(0)
    k1, k2 = jax.random.split(key)
    B, C, H, W = 2, 4, 16, 16

    net_output = jax.random.normal(k1, (B, C, H, W), dtype=jnp.float32)
    # one-hot binary target of the same shape (BCEWithLogitsLoss needs same shape)
    labels = jax.random.randint(k2, (B, H, W), 0, C)
    target = jax.nn.one_hot(labels, C, dtype=jnp.float32).transpose(0, 3, 1, 2)

    loss = dc_and_bce_loss(net_output, target)
    jax.block_until_ready(loss)

    ref = _reference(net_output, target)
    # Tolerance loosened slightly vs exact: the kernel uses the EUP approximate
    # reciprocal for the sigmoid (per perf review); error is ~1e-4 relative on s.
    assert jnp.allclose(loss, ref, atol=5e-3, rtol=1e-3), (loss, ref)

    print("KERNEL_OK")
</pallas_src>

<mosaic_0001>
module attributes {stable_mosaic.version = 11 : i64} {
  func.func @_dc_bce_kernel(%arg0: i32, %arg1: i32, %arg2: i32, %arg3: memref<8x256xf32, #tpu.memory_space<vmem>>, %arg4: memref<8x256xf32, #tpu.memory_space<vmem>>, %arg5: memref<1x8x256xf32, #tpu.memory_space<vmem>>, %arg6: memref<1x8x256xf32, #tpu.memory_space<vmem>>, %arg7: memref<1x8x256xf32, #tpu.memory_space<vmem>>, %arg8: memref<1x8x256xf32, #tpu.memory_space<vmem>>) attributes {dimension_semantics = [#tpu.dimension_semantics<parallel>, #tpu.dimension_semantics<parallel>, #tpu.dimension_semantics<arbitrary>], iteration_bounds = array<i64: 1, 1, 1>, scalar_prefetch = 0 : i64, scratch_operands = 0 : i64, tpu.core_type = #tpu.core_type<tc>, window_params = [{transform_indices = @transform_0, window_bounds = array<i64: 8, 256>}, {transform_indices = @transform_1, window_bounds = array<i64: 8, 256>}, {transform_indices = @transform_2, window_bounds = array<i64: 1, 8, 256>}, {transform_indices = @transform_3, window_bounds = array<i64: 1, 8, 256>}, {transform_indices = @transform_4, window_bounds = array<i64: 1, 8, 256>}, {transform_indices = @transform_5, window_bounds = array<i64: 1, 8, 256>}]} {
    %c0_i32 = arith.constant 0 : i32
    %0 = arith.cmpi eq, %arg2, %c0_i32 : i32
    %1 = arith.extui %0 : i1 to i32
    %c0_i32_0 = arith.constant 0 : i32
    %2 = arith.cmpi ne, %1, %c0_i32_0 : i32
    scf.if %2 {
      %cst_31 = arith.constant 0.000000e+00 : f32
      %47 = vector.broadcast %cst_31 : f32 to vector<1x8x256xf32>
      %c0_32 = arith.constant 0 : index
      %c0_33 = arith.constant 0 : index
      %c0_34 = arith.constant 0 : index
      %48 = vector.load %arg5[%c0_32, %c0_33, %c0_34] : memref<1x8x256xf32, #tpu.memory_space<vmem>>, vector<1x8x256xf32>
      tpu.vector_store %arg5[%c0_32, %c0_33, %c0_34], %47 {strides = array<i32>} : memref<1x8x256xf32, #tpu.memory_space<vmem>>, vector<1x8x256xf32>,
      %cst_35 = arith.constant 0.000000e+00 : f32
      %49 = vector.broadcast %cst_35 : f32 to vector<1x8x256xf32>
      %c0_36 = arith.constant 0 : index
      %c0_37 = arith.constant 0 : index
      %c0_38 = arith.constant 0 : index
      %50 = vector.load %arg6[%c0_36, %c0_37, %c0_38] : memref<1x8x256xf32, #tpu.memory_space<vmem>>, vector<1x8x256xf32>
      tpu.vector_store %arg6[%c0_36, %c0_37, %c0_38], %49 {strides = array<i32>} : memref<1x8x256xf32, #tpu.memory_space<vmem>>, vector<1x8x256xf32>,
      %cst_39 = arith.constant 0.000000e+00 : f32
      %51 = vector.broadcast %cst_39 : f32 to vector<1x8x256xf32>
      %c0_40 = arith.constant 0 : index
      %c0_41 = arith.constant 0 : index
      %c0_42 = arith.constant 0 : index
      %52 = vector.load %arg7[%c0_40, %c0_41, %c0_42] : memref<1x8x256xf32, #tpu.memory_space<vmem>>, vector<1x8x256xf32>
      tpu.vector_store %arg7[%c0_40, %c0_41, %c0_42], %51 {strides = array<i32>} : memref<1x8x256xf32, #tpu.memory_space<vmem>>, vector<1x8x256xf32>,
      %cst_43 = arith.constant 0.000000e+00 : f32
      %53 = vector.broadcast %cst_43 : f32 to vector<1x8x256xf32>
      %c0_44 = arith.constant 0 : index
      %c0_45 = arith.constant 0 : index
      %c0_46 = arith.constant 0 : index
      %54 = vector.load %arg8[%c0_44, %c0_45, %c0_46] : memref<1x8x256xf32, #tpu.memory_space<vmem>>, vector<1x8x256xf32>
      tpu.vector_store %arg8[%c0_44, %c0_45, %c0_46], %53 {strides = array<i32>} : memref<1x8x256xf32, #tpu.memory_space<vmem>>, vector<1x8x256xf32>,
    } else {
    }
    %c0 = arith.constant 0 : index
    %c0_1 = arith.constant 0 : index
    %3 = vector.load %arg3[%c0, %c0_1] : memref<8x256xf32, #tpu.memory_space<vmem>>, vector<8x256xf32>
    %c0_2 = arith.constant 0 : index
    %c0_3 = arith.constant 0 : index
    %4 = vector.load %arg4[%c0_2, %c0_3] : memref<8x256xf32, #tpu.memory_space<vmem>>, vector<8x256xf32>
    %5 = math.absf %3 : vector<8x256xf32>
    %cst = arith.constant 0.000000e+00 : f32
    %6 = vector.broadcast %cst : f32 to vector<8x256xf32>
    %7 = arith.subf %6, %5 : vector<8x256xf32>
    %8 = math.exp %7 : vector<8x256xf32>
    %cst_4 = arith.constant 1.000000e+00 : f32
    %9 = vector.broadcast %cst_4 : f32 to vector<8x256xf32>
    %10 = arith.addf %9, %8 : vector<8x256xf32>
    %11 = tpu.reciprocal %10 {approx = true} : vector<8x256xf32> -> vector<8x256xf32>
    %cst_5 = arith.constant 0.000000e+00 : f32
    %12 = vector.broadcast %cst_5 : f32 to vector<8x256xf32>
    %13 = arith.cmpf oge, %3, %12 : vector<8x256xf32>
    %14 = arith.mulf %8, %11 : vector<8x256xf32>
    %15 = arith.select %13, %11, %14 : vector<8x256xi1>, vector<8x256xf32>
    %cst_6 = arith.constant 0.000000e+00 : f32
    %16 = vector.broadcast %cst_6 : f32 to vector<8x256xf32>
    %17 = arith.maximumf %3, %16 : vector<8x256xf32>
    %18 = arith.mulf %3, %4 : vector<8x256xf32>
    %19 = arith.subf %17, %18 : vector<8x256xf32>
    %20 = math.log1p %8 : vector<8x256xf32>
    %21 = arith.addf %19, %20 : vector<8x256xf32>
    %c0_7 = arith.constant 0 : index
    %c0_8 = arith.constant 0 : index
    %c0_9 = arith.constant 0 : index
    %22 = vector.load %arg5[%c0_7, %c0_8, %c0_9] : memref<1x8x256xf32, #tpu.memory_space<vmem>>, vector<1x8x256xf32>
    %23 = vector.shape_cast %22 : vector<1x8x256xf32> to vector<8x256xf32>
    %24 = arith.mulf %15, %4 : vector<8x256xf32>
    %25 = arith.addf %23, %24 : vector<8x256xf32>
    %c0_10 = arith.constant 0 : index
    %c0_11 = arith.constant 0 : index
    %c0_12 = arith.constant 0 : index
    %26 = vector.load %arg5[%c0_10, %c0_11, %c0_12] : memref<1x8x256xf32, #tpu.memory_space<vmem>>, vector<1x8x256xf32>
    %27 = vector.shape_cast %26 : vector<1x8x256xf32> to vector<8x256xf32>
    %28 = vector.shape_cast %25 : vector<8x256xf32> to vector<1x8x256xf32>
    tpu.vector_store %arg5[%c0_10, %c0_11, %c0_12], %28 {strides = array<i32>} : memref<1x8x256xf32, #tpu.memory_space<vmem>>, vector<1x8x256xf32>,
    %c0_13 = arith.constant 0 : index
    %c0_14 = arith.constant 0 : index
    %c0_15 = arith.constant 0 : index
    %29 = vector.load %arg6[%c0_13, %c0_14, %c0_15] : memref<1x8x256xf32, #tpu.memory_space<vmem>>, vector<1x8x256xf32>
    %30 = vector.shape_cast %29 : vector<1x8x256xf32> to vector<8x256xf32>
    %31 = arith.addf %30, %15 : vector<8x256xf32>
    %c0_16 = arith.constant 0 : index
    %c0_17 = arith.constant 0 : index
    %c0_18 = arith.constant 0 : index
    %32 = vector.load %arg6[%c0_16, %c0_17, %c0_18] : memref<1x8x256xf32, #tpu.memory_space<vmem>>, vector<1x8x256xf32>
    %33 = vector.shape_cast %32 : vector<1x8x256xf32> to vector<8x256xf32>
    %34 = vector.shape_cast %31 : vector<8x256xf32> to vector<1x8x256xf32>
    tpu.vector_store %arg6[%c0_16, %c0_17, %c0_18], %34 {strides = array<i32>} : memref<1x8x256xf32, #tpu.memory_space<vmem>>, vector<1x8x256xf32>,
    %c0_19 = arith.constant 0 : index
    %c0_20 = arith.constant 0 : index
    %c0_21 = arith.constant 0 : index
    %35 = vector.load %arg7[%c0_19, %c0_20, %c0_21] : memref<1x8x256xf32, #tpu.memory_space<vmem>>, vector<1x8x256xf32>
    %36 = vector.shape_cast %35 : vector<1x8x256xf32> to vector<8x256xf32>
    %37 = arith.addf %36, %4 : vector<8x256xf32>
    %c0_22 = arith.constant 0 : index
    %c0_23 = arith.constant 0 : index
    %c0_24 = arith.constant 0 : index
    %38 = vector.load %arg7[%c0_22, %c0_23, %c0_24] : memref<1x8x256xf32, #tpu.memory_space<vmem>>, vector<1x8x256xf32>
    %39 = vector.shape_cast %38 : vector<1x8x256xf32> to vector<8x256xf32>
    %40 = vector.shape_cast %37 : vector<8x256xf32> to vector<1x8x256xf32>
    tpu.vector_store %arg7[%c0_22, %c0_23, %c0_24], %40 {strides = array<i32>} : memref<1x8x256xf32, #tpu.memory_space<vmem>>, vector<1x8x256xf32>,
    %c0_25 = arith.constant 0 : index
    %c0_26 = arith.constant 0 : index
    %c0_27 = arith.constant 0 : index
    %41 = vector.load %arg8[%c0_25, %c0_26, %c0_27] : memref<1x8x256xf32, #tpu.memory_space<vmem>>, vector<1x8x256xf32>
    %42 = vector.shape_cast %41 : vector<1x8x256xf32> to vector<8x256xf32>
    %43 = arith.addf %42, %21 : vector<8x256xf32>
    %c0_28 = arith.constant 0 : index
    %c0_29 = arith.constant 0 : index
    %c0_30 = arith.constant 0 : index
    %44 = vector.load %arg8[%c0_28, %c0_29, %c0_30] : memref<1x8x256xf32, #tpu.memory_space<vmem>>, vector<1x8x256xf32>
    %45 = vector.shape_cast %44 : vector<1x8x256xf32> to vector<8x256xf32>
    %46 = vector.shape_cast %43 : vector<8x256xf32> to vector<1x8x256xf32>
    tpu.vector_store %arg8[%c0_28, %c0_29, %c0_30], %46 {strides = array<i32>} : memref<1x8x256xf32, #tpu.memory_space<vmem>>, vector<1x8x256xf32>,
    return
  }
  func.func @transform_0(%arg0: i32, %arg1: i32, %arg2: i32) -> (i32, i32) {
    %c1_i32 = arith.constant 1 : i32
    %0 = arith.muli %arg0, %c1_i32 : i32
    %1 = arith.addi %0, %arg2 : i32
    %c0_i32 = arith.constant 0 : i32
    %2 = arith.minsi %1, %c0_i32 : i32
    %c0_i32_0 = arith.constant 0 : i32
    return %arg1, %2 : i32, i32
  }
  func.func @transform_1(%arg0: i32, %arg1: i32, %arg2: i32) -> (i32, i32) {
    %c1_i32 = arith.constant 1 : i32
    %0 = arith.muli %arg0, %c1_i32 : i32
    %1 = arith.addi %0, %arg2 : i32
    %c0_i32 = arith.constant 0 : i32
    %2 = arith.minsi %1, %c0_i32 : i32
    %c0_i32_0 = arith.constant 0 : i32
    return %arg1, %2 : i32, i32
  }
  func.func @transform_2(%arg0: i32, %arg1: i32, %arg2: i32) -> (i32, i32, i32) {
    %c0_i32 = arith.constant 0 : i32
    %c0_i32_0 = arith.constant 0 : i32
    return %arg0, %arg1, %c0_i32 : i32, i32, i32
  }
  func.func @transform_3(%arg0: i32, %arg1: i32, %arg2: i32) -> (i32, i32, i32) {
    %c0_i32 = arith.constant 0 : i32
    %c0_i32_0 = arith.constant 0 : i32
    return %arg0, %arg1, %c0_i32 : i32, i32, i32
  }
  func.func @transform_4(%arg0: i32, %arg1: i32, %arg2: i32) -> (i32, i32, i32) {
    %c0_i32 = arith.constant 0 : i32
    %c0_i32_0 = arith.constant 0 : i32
    return %arg0, %arg1, %c0_i32 : i32, i32, i32
  }
  func.func @transform_5(%arg0: i32, %arg1: i32, %arg2: i32) -> (i32, i32, i32) {
    %c0_i32 = arith.constant 0 : i32
    %c0_i32_0 = arith.constant 0 : i32
    return %arg0, %arg1, %c0_i32 : i32, i32, i32
  }
}

</mosaic_0001>

<bundles_post_ra>
// kernel: tpu_custom_call.1
= control target key start
LH: loop header
LB: loop body
LE: loop exit
PB: predicated region body
PF: predicated region fallthrough
CT: control target
= control target key end

     0   :  { %11 = vsyncpa [#allocation3], 0  ;;  %s473_s0 = inlined_call_operand.hbm [shape: f32[8,256], index: 0, kind: input, shape index: {}]   ;;  %s474_s1 = inlined_call_operand.hbm [shape: f32[8,256], index: 1, kind: input, shape index: {}]   ;;  %s475_s2 = inlined_call_operand.hbm [shape: f32[1,8,256], index: 2, kind: output, shape index: {0}]   ;;  %s476_s3 = inlined_call_operand.hbm [shape: f32[1,8,256], index: 3, kind: output, shape index: {1}]   ;;  %s477_s4 = inlined_call_operand.hbm [shape: f32[1,8,256], index: 4, kind: output, shape index: {2}]   ;;  %s478_s5 = inlined_call_operand.hbm [shape: f32[1,8,256], index: 5, kind: output, shape index: {3}]  }
   0x1   :  { %12 = vsyncpa [#allocation6], 0 }
   0x2   :  { %13 = vsyncpa [#allocation4], 0 }
   0x3   :  { %14 = vsyncpa [#allocation9], 0 }
   0x4   :  { %15 = vsyncpa [#allocation12], 0  ;;  %s27_s20 = sshll.u32 %s473_s0, 4  ;;  %s394_s21 = smov [#allocation2]   ;;  %s28_s20 = int_to_ptr.hbm [resolvable:$true] %s27_s20 }
   0x5   :  { %s29_s22 = sshll.u32 %s394_s21, 4  ;;  %s44_s25 = sshll.u32 %s474_s1, 4  ;;  %s30_s22 = int_to_ptr.vmem [resolvable:$true] %s29_s22  ;;  %s45_s25 = int_to_ptr.hbm [resolvable:$true] %s44_s25 }
   0x6   :  { %32 = dma.hbm_to_vmem [thread:$0]  %s28_s20, 256, %s30_s22, [#allocation3]  }
   0x7   :  { %s395_s26 = smov [#allocation5]  }
   0x8   :  { %s46_s27 = sshll.u32 %s395_s26, 4  ;;  %s47_s27 = int_to_ptr.vmem [resolvable:$true] %s46_s27 }
   0x9   :  { %49 = dma.hbm_to_vmem [thread:$0]  %s45_s25, 256, %s47_s27, [#allocation6]  }
   0xa   :  { %384 = dma.done.wait [#allocation3], 256  }
   0xb   :  { %385 = vsyncadd [#allocation3], 4294967040 }
   0xc   :  { %386 = dma.done.wait [#allocation6], 256  }
   0xd   :  { %387 = vsyncadd [#allocation6], 4294967040  ;;  %v78_v0 = vld [vmem:[#allocation2] sm:$0xff]  ;;  %v79_v1 = vld [vmem:[#allocation2 + $0x8] sm:$0xff]  ;;  %s170_s28 = sshll.u32 %s476_s3, 4  ;;  %s396_s29 = smov [#allocation8]   ;;  %s441_s28 = int_to_ptr.hbm [resolvable:$true] %s170_s28 }
   0xe   :  { %v82_v2 = vand.u32 2147483647, %v78_v0  ;;  %v83_v3 = vand.u32 2147483647, %v79_v1  ;;  %v80_v4 = vld [vmem:[#allocation5] sm:$0xff]  ;;  %v81_v5 = vld [vmem:[#allocation5 + $0x8] sm:$0xff] }
   0xf   :  { %144 = vst [vmem:[#allocation10] sm:$0xff] %v80_v4  ;;  %v100_v17 = vmax.f32 %v78_v0, 0.0  ;;  %v102_v18 = vmul.f32 %v80_v4, %v78_v0  ;;  %s439_s30 = sshll.u32 %s396_s29, 4  ;;  %v101_v21 = vmax.f32 %v79_v1, 0.0  ;;  %v103_v22 = vmul.f32 %v81_v5, %v79_v1  ;;  %s397_s3 = smov [#allocation7]   ;;  %s169_s30 = int_to_ptr.vmem [resolvable:$true] %s439_s30 }
  0x10   :  { %v84_v6 = vsub.f32 0.0, %v82_v2  ;;  %v85_v7 = vsub.f32 0.0, %v83_v3  ;;  %145 = vst [vmem:[#allocation10 + $0x8] sm:$0xff] %v81_v5  ;;  %vm94_vm0 = vcmp.ge.f32.partialorder %v78_v0, 0.0  ;;  %vm95_vm1 = vcmp.ge.f32.partialorder %v79_v1, 0.0  ;;  %s448_s6 = sshll.u32 %s397_s3, 4  ;;  %s158_s6 = int_to_ptr.vmem [resolvable:$true] %s448_s6 }
  0x11   :  { %v104_v30 = vsub.f32 %v100_v17, %v102_v18  ;;  %s159_s9 = sshll.u32 %s475_s2, 4  ;;  %v105_v36 = vsub.f32 %v101_v21, %v103_v22  ;;  %s398_s10 = smov [#allocation10]   ;;  %s160_s9 = int_to_ptr.hbm [resolvable:$true] %s159_s9 }
  0x12   :  { %v86_v8 = vmul.f32 1.442695, %v84_v6  ;;  %v88_v9 = vmul.f32 1.442695, %v85_v7  ;;  %s179_s11 = sshll.u32 %s398_s10, 4  ;;  %s181_s14 = sshll.u32 %s477_s4, 4  ;;  %s180_s11 = int_to_ptr.vmem [resolvable:$true] %s179_s11  ;;  %s182_s14 = int_to_ptr.hbm [resolvable:$true] %s181_s14 }
  0x13   :  { %s399_s2 = smov [#allocation11]   ;;  %s192_s18 = sshll.u32 %s478_s5, 4  ;;  %s193_s18 = int_to_ptr.hbm [resolvable:$true] %s192_s18 }
  0x14   :  { %228 = vpow2.f32 %v86_v8  ;;  %s190_s15 = sshll.u32 %s399_s2, 4  ;;  %s191_s15 = int_to_ptr.vmem [resolvable:$true] %s190_s15 }
  0x15   :  { %230 = vpow2.f32 %v88_v9 }
  0x1a   :  { %v229_v10 = vpop.eup %228 }
  0x1b   :  { %v231_v11 = vpop.eup %230  ;;  %v90_v12 = vadd.f32 1.0, %v229_v10  ;;  %v109_v14 = vmul.f32 -0.5, %v229_v10  ;;  %v112_v19 = vand.u32 2147483647, %v229_v10 }
  0x1c   :  { %v91_v13 = vadd.f32 1.0, %v231_v11  ;;  %v118_v15 = vmul.f32 -0.5, %v231_v11  ;;  %v121_v23 = vand.u32 2147483647, %v231_v11 }
  0x1d   :  { %232 = vrcp.f32 %v90_v12  ;;  %v110_v16 = vadd.f32 1.0, %v109_v14  ;;  %vm444_vm2 = vcmp.lt.f32.partialorder %v112_v19, 0.0004427343 }
  0x1e   :  { %234 = vrcp.f32 %v91_v13  ;;  %v119_v20 = vadd.f32 1.0, %v118_v15  ;;  %vm454_vm3 = vcmp.lt.f32.partialorder %v121_v23, 0.0004427343 }
  0x1f   :  { %236 = vlog2.f32 %v90_v12  ;;  %v111_v27 = vmul.f32 %v229_v10, %v110_v16 }
  0x20   :  { %238 = vlog2.f32 %v91_v13  ;;  %v120_v32 = vmul.f32 %v231_v11, %v119_v20 }
  0x23   :  { %v233_v24 = vpop.eup %232 }
  0x24   :  { %v235_v25 = vpop.eup %234  ;;  %v96_v26 = vmul.f32 %v233_v24, %v229_v10 }
  0x25   :  { %v237_v28 = vpop.eup %236  ;;  %v97_v29 = vmul.f32 %v235_v25, %v231_v11 }
  0x26   :  { %v239_v33 = vpop.eup %238  ;;  %v98_v34 = vsel %vm94_vm0, %v233_v24, %v96_v26  ;;  %v108_v35 = vmul.f32 0.6931472, %v237_v28 }
  0x27   :  { %v99_v38 = vsel %vm95_vm1, %v235_v25, %v97_v29  ;;  %v128_v39 = vmul.f32 %v98_v34, %v80_v4  ;;  %v117_v40 = vmul.f32 0.6931472, %v239_v33  ;;  %138 = vst [vmem:[#allocation8] sm:$0xff] %v98_v34 }
  0x28   :  { %v129_v41 = vmul.f32 %v99_v38, %v81_v5  ;;  %v114_v42 = vsel %vm444_vm2, %v111_v27, %v108_v35  ;;  %139 = vst [vmem:[#allocation8 + $0x8] sm:$0xff] %v99_v38 }
  0x29   :  { %v124_v43 = vadd.f32 %v114_v42, %v104_v30  ;;  %v123_v44 = vsel %vm454_vm3, %v120_v32, %v117_v40  ;;  %132 = vst [vmem:[#allocation7] sm:$0xff] %v128_v39  ;;  %173 = dma.vmem_to_hbm [thread:$0]  %s169_s30, 256, %s441_s28, [#allocation9]  }
  0x2a   :  { %v125_v45 = vadd.f32 %v123_v44, %v105_v36  ;;  %133 = vst [vmem:[#allocation7 + $0x8] sm:$0xff] %v129_v41  ;;  %184 = dma.vmem_to_hbm [thread:$0]  %s180_s11, 256, %s182_s14, [#allocation9]  }
  0x2b   :  { %150 = vst [vmem:[#allocation11] sm:$0xff] %v124_v43  ;;  %162 = dma.vmem_to_hbm [thread:$0]  %s158_s6, 256, %s160_s9, [#allocation4]  }
  0x2c   :  { %151 = vst [vmem:[#allocation11 + $0x8] sm:$0xff] %v125_v45 }
  0x2d   :  { %195 = dma.vmem_to_hbm [thread:$0]  %s191_s15, 256, %s193_s18, [#allocation12]  }
  0x2e   :  { %388 = dma.done.wait [#allocation4], 256  }
  0x2f   :  { %389 = vsyncadd [#allocation4], 4294967040 }
  0x30   :  { %390 = dma.done.wait [#allocation9], 512  }
  0x31   :  { %391 = vsyncadd [#allocation9], 4294966784 }
  0x32   :  { %392 = dma.done.wait [#allocation12], 256  }
  0x33   :  { %393 = vsyncadd [#allocation12], 4294967040 }
  0x34   :  { %212 = vsyncpa [#allocation3], 1 }
  0x35   :  { %213 = vsyncpa [#allocation6], 1 }
  0x36   :  { %214 = vsyncpa [#allocation4], 1 }
  0x37   :  { %215 = vsyncpa [#allocation9], 1 }
  0x38   :  { %216 = vsyncpa [#allocation12], 1 }

</bundles_post_ra>
